<compile_context>
chip_gen: v7x
topology: tpu7x:2x2x1
jax: 0.10.0
libtpu: 0.0.40
codegen_flags: <defaults>
</compile_context>

<pallas_src>
import jax
import jax.numpy as jnp
from jax.experimental import pallas as pl
from jax.experimental.pallas import tpu as pltpu

_LANES = 128               # lane (fast) axis width
_TARGET_TILE_ROWS = 4096   # 4096 * 128 * 4B = 2 MiB/buffer; ~8 MiB with
                           # double-buffered input + output — fits v5e/v6e/v7x
                           # default scoped VMEM limits.


def _decoder_kernel(x_ref, o_ref):
    # Placeholder hot path: elementwise passthrough of the current VMEM tile.
    # TODO(synk): a concrete decoder's conv/matmul/upsample compute goes here.
    o_ref[...] = x_ref[...]


def _round_up(v, m):
    return (v + m - 1) // m * m


@jax.jit
def _decoder_identity_pallas(x):
    """Debug-only Pallas passthrough scaffold (lane-dense copy, no pad/slice)."""
    orig_shape = x.shape
    total = x.size
    itemsize = x.dtype.itemsize
    # Second-minor (sublane) granularity: 8 rows for 4B, 16 for 2B, 32 for 1B.
    sub = 8 * max(1, 4 // itemsize)

    flat = x.reshape(-1)
    rows = total // _LANES             # 128-aligned bulk only — no jnp.pad
    tail = total - rows * _LANES

    if rows == 0:
        # Entire tensor is a <128-element tail; nothing worth a kernel launch.
        return x

    bulk = flat[: rows * _LANES].reshape(rows, _LANES)

    # Pick the tile so there are >=2 (targeting ~4) grid steps whenever
    # possible, keeping the block a multiple of the sublane granularity and
    # capped at ~2 MiB so the double-buffered footprint stays small.
    if rows <= sub:
        tile_r = rows                  # tiny input: single full-extent block
    else:
        tile_r = min(_TARGET_TILE_ROWS,
                     max(sub, _round_up(pl.cdiv(rows, 4), sub)))
    grid = (pl.cdiv(rows, tile_r),)

    out_bulk = pl.pallas_call(
        _decoder_kernel,
        out_shape=jax.ShapeDtypeStruct((rows, _LANES), bulk.dtype),
        grid=grid,
        in_specs=[pl.BlockSpec((tile_r, _LANES), lambda i: (i, 0))],
        out_specs=pl.BlockSpec((tile_r, _LANES), lambda i: (i, 0)),
        compiler_params=pltpu.CompilerParams(
            # TODO(synk): use pltpu.CORE_PARALLEL when explicitly targeting
            # v7x (2 TCs/chip); "parallel" is a harmless hint elsewhere.
            dimension_semantics=("parallel",),
        ),
    )(bulk)

    if tail:
        # <128-element tail is carried around the kernel — never a full-size
        # pad or slice of the whole tensor.
        out_flat = jnp.concatenate([out_bulk.reshape(-1), flat[rows * _LANES:]])
    else:
        out_flat = out_bulk.reshape(-1)
    return out_flat.reshape(orig_shape)


def decoder_forward(cfg, x, *, run_pallas_scaffold=False):
    """Pallas 'forward' for the abstract Decoder.

    Args:
      cfg: configuration (unused — the base class only stores it).
      x:   input tensor (any shape/dtype).
      run_pallas_scaffold: if True, route through the Pallas passthrough
        scaffold (debug / subclass hook). Default False: the abstract forward
        has no compute, so skip the HBM round-trip entirely.

    Returns:
      Same shape/dtype output (identity, since the reference forward is abstract).
    """
    del cfg  # stored-only in the reference module
    if run_pallas_scaffold:
        return _decoder_identity_pallas(x)
    return x


if __name__ == "__main__":
    key = jax.random.PRNGKey(0)
    # Small shapes consistent with a decoder-style feature map input (NCHW).
    x = jax.random.normal(key, (2, 4, 16, 16), dtype=jnp.float32)
    cfg = {"name": "decoder_base"}

    # Default production path: zero-cost passthrough (no HBM traffic).
    y_fast = decoder_forward(cfg, x)
    # Debug path: exercise the Pallas scaffold so the kernel compiles + runs.
    y_pallas = decoder_forward(cfg, x, run_pallas_scaffold=True)
    jax.block_until_ready(y_pallas)

    assert y_fast.shape == x.shape and y_fast.dtype == x.dtype
    assert y_pallas.shape == x.shape and y_pallas.dtype == x.dtype
    assert bool(jnp.allclose(y_fast, x))
    assert bool(jnp.allclose(y_pallas, x))
    print("KERNEL_OK")
</pallas_src>

<mosaic_0001>
module attributes {stable_mosaic.version = 11 : i64} {
  func.func @_decoder_kernel(%arg0: i32, %arg1: memref<8x128xf32, #tpu.memory_space<vmem>>, %arg2: memref<8x128xf32, #tpu.memory_space<vmem>>) attributes {dimension_semantics = [#tpu.dimension_semantics<parallel>], iteration_bounds = array<i64: 2>, scalar_prefetch = 0 : i64, scratch_operands = 0 : i64, tpu.core_type = #tpu.core_type<tc>, window_params = [{transform_indices = @transform_0, window_bounds = array<i64: 8, 128>}, {transform_indices = @transform_1, window_bounds = array<i64: 8, 128>}]} {
    %c0 = arith.constant 0 : index
    %c0_0 = arith.constant 0 : index
    %0 = vector.load %arg1[%c0, %c0_0] : memref<8x128xf32, #tpu.memory_space<vmem>>, vector<8x128xf32>
    %c0_1 = arith.constant 0 : index
    %c0_2 = arith.constant 0 : index
    %1 = vector.load %arg2[%c0_1, %c0_2] : memref<8x128xf32, #tpu.memory_space<vmem>>, vector<8x128xf32>
    tpu.vector_store %arg2[%c0_1, %c0_2], %0 {strides = array<i32>} : memref<8x128xf32, #tpu.memory_space<vmem>>, vector<8x128xf32>,
    return
  }
  func.func @transform_0(%arg0: i32) -> (i32, i32) {
    %c0_i32 = arith.constant 0 : i32
    %c0_i32_0 = arith.constant 0 : i32
    return %arg0, %c0_i32 : i32, i32
  }
  func.func @transform_1(%arg0: i32) -> (i32, i32) {
    %c0_i32 = arith.constant 0 : i32
    %c0_i32_0 = arith.constant 0 : i32
    return %arg0, %c0_i32 : i32, i32
  }
}

</mosaic_0001>

<bundles_post_ra>
// kernel: _decoder_identity_pallas.1
= control target key start
LH: loop header
LB: loop body
LE: loop exit
PB: predicated region body
PF: predicated region fallthrough
CT: control target
= control target key end

     0   :  { %s188_s6 = smov 0   ;;  %s208_s0 = inlined_call_operand.vmem [shape: f32[16,128], index: 0, kind: input, shape index: {}]   ;;  %s209_s1 = inlined_call_operand.vmem [shape: f32[16,128], index: 1, kind: output, shape index: {}]  }
   0x1 LB: > { %s167_s7 = sadd.s32 4294967295, %s190_s6   ;;  %p171_p0 = scmp.ge.s32.totalorder %s190_s6, 1  ;;  %s190_s6 = sphi %s188_s6, %s11_s6  }
   0x2   : > { %p86_p1 = scmp.lt.s32.totalorder %s190_s6, 3 }
   0x4   : > { %p87_p2 = pnand %p171_p0, %p86_p1 }
   0x5   : > { %p104_p3 = scmp.lt.s32.totalorder (!%p87_p2), %s167_s7, 1 }
   0x6   : > { %90 = sbr.rel (%p87_p2) target bundleno = 18 (0x12), region = 24 }
   0xd   : > { %s211_s7 = smov (!%p104_p3, %s167_s7), 1 }
   0xe   : > { %s172_s8 = sshll.u32 %s211_s7, 3 }
   0xf   : > { %s107_s11 = scalar_lea.vmem %s208_s0, %s172_s8  ;;  %s111_s14 = scalar_lea.vmem %s209_s1, %s172_s8 }
  0x10   : > { %v112_v0 = vld [vmem:[%s107_s11] sm:$0xff] }
  0x11   : > { %113 = vst [vmem:[%s111_s14] sm:$0xff] %v112_v0 }
  0x12 PF: > { %s11_s6 = sadd.s32 1, %s190_s6  }
  0x13   : > { %p8_p4 = scmp.ge.s32.totalorder %s11_s6, 4  }
  0x15   :  { %10 = sbr.rel (!%p8_p4) target bundleno = 1 (0x1), region = 54 }

</bundles_post_ra>
